<compile_context>
chip_gen: v6e
topology: v6e:2x2x1
jax: 0.10.0
libtpu: 0.0.40
codegen_flags: <defaults>
</compile_context>

<pallas_src>
import functools

import jax
import jax.numpy as jnp
from jax.experimental import pallas as pl
from jax.experimental.pallas import tpu as pltpu

LN_EPS = 1e-5  # nn.LayerNorm default


# ----------------------------------------------------------------------------
# Pallas kernel: full 'cnn' branch forward for one batch TILE (bt elements) per
# grid step.  Activations live as (C, N=bt*L) f32 slabs with lanes grouped [b][l];
# matmul operands are cast to `convw_ref.dtype` (f32 or bf16) just before the dot.
# ----------------------------------------------------------------------------
def _cnn_kernel(L, x_ref, convw_ref, convb_ref, gamma_ref, beta_ref,
                e_ref, et_ref, wd_ref, bd_ref, wl_ref, bl_ref, out_ref):
    cdtype = convw_ref.dtype
    x = x_ref[0].astype(jnp.float32)     # (C, N)
    C, N = x.shape
    inv_L = 1.0 / L

    # Boundary masks for the zero-padded conv shifts, built ONCE as (1, N) and
    # broadcast inside jnp.where (saves C x the iota/mod/cmp work and vregs).
    col = jax.lax.broadcasted_iota(jnp.int32, (1, N), 1) % L
    mask_first = col != 0               # l == 0     -> left pad is zero
    mask_last = col != (L - 1)          # l == L - 1 -> right pad is zero

    def conv(h, i):
        # +/-1 shifts along the length axis on the XLU (roll) + VPU (mask); the
        # per-batch-segment boundaries are exactly the zero-pad positions, so the
        # roll wrap across segments is masked away.  The three taps are stacked on
        # the sublane axis and consumed by a SINGLE (C, 3C) @ (3C, N) matmul.
        h_m1 = jnp.where(mask_first, pltpu.roll(h, 1, 1), 0.0)       # h[:, l-1]
        h_p1 = jnp.where(mask_last, pltpu.roll(h, N - 1, 1), 0.0)    # h[:, l+1]
        hs = jnp.concatenate([h_m1, h, h_p1], axis=0).astype(cdtype)  # (3C, N)
        return (jnp.dot(convw_ref[i], hs, preferred_element_type=jnp.float32)
                + convb_ref[i])                                       # bias (C, 1)

    def res_block(h, i):
        r = jnp.maximum(conv(h, 2 * i), 0.0)
        r = conv(r, 2 * i + 1)
        return h + r

    h = res_block(x, 0)                 # back_bone1 (2 res blocks)
    h = res_block(h, 1)
    h = jnp.maximum(h, 0.0)             # relu
    h = res_block(h, 2)                 # back_bone2 (2 res blocks)
    h = res_block(h, 3)
    h = h + x                           # residual with the original input

    # LayerNorm over each length-L lane segment, fused stats: one stacked
    # [h; h*h] @ E segment-sum and one broadcast-back matmul (f32 throughout).
    hh = jnp.concatenate([h, h * h], axis=0)                                # (2C, N)
    s = jnp.dot(hh, e_ref[...], preferred_element_type=jnp.float32) * inv_L  # (2C, bt)
    sf = jnp.dot(s, et_ref[...], preferred_element_type=jnp.float32)         # (2C, N)
    mean_f = sf[:C]
    var_f = jnp.maximum(sf[C:] - mean_f * mean_f, 0.0)
    hn = (h - mean_f) * jax.lax.rsqrt(var_f + LN_EPS)
    hn = hn * gamma_ref[...] + beta_ref[...]                                  # (1, N) each

    # Linear over dims (per segment) as ONE block-diagonal matmul:
    #   (C, bt*L) @ (bt*L, bt*Dout) -> (C, bt*Dout), columns grouped [b][d]
    o1 = (jnp.dot(hn.astype(cdtype), wd_ref[...],
                  preferred_element_type=jnp.float32) + bd_ref[...])
    # Linear over len (== permute -> Linear -> permute):
    #   (Lout, C) @ (C, bt*Dout) -> (Lout, bt*Dout)   (lane-dense store)
    out = (jnp.dot(wl_ref[...], o1.astype(cdtype),
                   preferred_element_type=jnp.float32) + bl_ref[...])
    out_ref[0] = out


def _pick_bt(B, L, Dout, *, lane_cap=1024, kron_cap_bytes=2 << 20, max_bt=32):
    """Pick the batch tile for the cnn branch.

    Preference order: (1) lane-dense activation slab (bt*L % 128 == 0),
    (2) >= 2 grid steps (second v7x TensorCore + DMA/compute overlap),
    (3) lane-dense output stores (bt*Dout % 128 == 0), (4) largest tile.
    The lane cap (~1024) keeps the live (C, N) f32 slabs inside the 64-vreg file;
    the kron cap and max_bt bound the O(bt^2) block-diagonal dim-projection weight.
    """
    best = None
    for cand in range(1, min(B, max_bt) + 1):
        if B % cand:
            continue
        N, ND = cand * L, cand * Dout
        if cand > 1 and N > lane_cap:
            continue
        if cand > 1 and N * ND * 4 > kron_cap_bytes:
            continue
        key = (N % 128 == 0, B // cand >= 2, ND % 128 == 0, cand)
        if best is None or key > best[0]:
            best = (key, cand)
    # Fall back to a single full-extent block (always a legal BlockSpec).
    return best[1] if best is not None else B


def make_muti_task_projection_cnn(conv_w, conv_b, gamma, beta, Wd, bd, Wl, bl,
                                  *, batch, bt=None, matmul_dtype=jnp.bfloat16):
    """Build the 'cnn'-branch projection once (grid-invariant derived params are
    computed and cached here) and return `apply(x)`.

    conv_w: (8, C, C, 3) PyTorch Conv1d layout, conv_b: (8, C).
    Wd: (output_dims, input_dims), Wl: (output_len, input_len)  (PyTorch Linear layouts).
    """
    NC, C, _, K = conv_w.shape
    assert K == 3
    Dout, L = Wd.shape
    Lout = Wl.shape[0]
    B = batch
    if bt is None:
        bt = _pick_bt(B, L, Dout)
    assert B % bt == 0, "batch tile must divide batch"
    G = B // bt
    N = bt * L
    ND = bt * Dout
    f32 = jnp.float32

    # ---- grid-invariant parameter plumbing (computed once, reused per call) ----
    # Fused conv weight: (layer, Cout, 3*Cin), column blocks [tap -1][tap 0][tap +1].
    convw_k = jnp.transpose(conv_w, (0, 1, 3, 2)).reshape(NC, C, 3 * C).astype(matmul_dtype)
    convb_k = conv_b.astype(f32)[:, :, None]                  # (NC, C, 1)
    gamma_t = jnp.tile(gamma.astype(f32), bt)[None, :]        # (1, N)
    beta_t = jnp.tile(beta.astype(f32), bt)[None, :]          # (1, N)
    seg = jnp.repeat(jnp.arange(bt), L)
    E = (seg[:, None] == jnp.arange(bt)[None, :]).astype(f32)  # (N, bt)  segment sum
    Et = E.T                                                   # (bt, N)  broadcast back
    Wd_bd = jnp.kron(jnp.eye(bt, dtype=f32), Wd.T.astype(f32)).astype(matmul_dtype)  # (N, ND)
    bd_t = jnp.tile(bd.astype(f32), bt)[None, :]               # (1, ND)
    Wl_k = Wl.astype(matmul_dtype)                              # (Lout, C)
    bl_k = bl.astype(f32)[:, None]                              # (Lout, 1)
    consts = (convw_k, convb_k, gamma_t, beta_t, E, Et, Wd_bd, bd_t, Wl_k, bl_k)

    # Explicit VMEM budget (v7x only has 64 MiB): 2x (double buffer) the per-step
    # block footprint plus headroom, never below the 32 MiB scoped default.
    itemsize = jnp.dtype(matmul_dtype).itemsize
    block_bytes = (C * N * itemsize
                   + sum(int(a.size) * a.dtype.itemsize for a in consts)
                   + Lout * ND * 4)
    vmem_limit = int(max(32 << 20, min(2 * block_bytes + (4 << 20), 100 << 20)))

    grid_spec = pltpu.PrefetchScalarGridSpec(
        num_scalar_prefetch=0,
        grid=(G,),
        in_specs=[
            pl.BlockSpec((1, C, N), lambda g: (g, 0, 0)),            # x tile
            pl.BlockSpec((NC, C, 3 * C), lambda g: (0, 0, 0)),       # fused conv weights
            pl.BlockSpec((NC, C, 1), lambda g: (0, 0, 0)),           # conv biases
            pl.BlockSpec((1, N), lambda g: (0, 0)),                  # gamma (tiled)
            pl.BlockSpec((1, N), lambda g: (0, 0)),                  # beta  (tiled)
            pl.BlockSpec((N, bt), lambda g: (0, 0)),                 # segment-sum E
            pl.BlockSpec((bt, N), lambda g: (0, 0)),                 # broadcast-back E^T
            pl.BlockSpec((N, ND), lambda g: (0, 0)),                 # block-diag Wd^T
            pl.BlockSpec((1, ND), lambda g: (0, 0)),                 # bd (tiled)
            pl.BlockSpec((Lout, C), lambda g: (0, 0)),               # Wl
            pl.BlockSpec((Lout, 1), lambda g: (0, 0)),               # bl
        ],
        out_specs=pl.BlockSpec((1, Lout, ND), lambda g: (g, 0, 0)),
    )
    # TODO(synk): at production sizes, single-buffer the constant-index weight blocks
    # (pipeline_mode=pl.Buffered(1)) to halve their VMEM cost on v7x.
    call = pl.pallas_call(
        functools.partial(_cnn_kernel, L),
        out_shape=jax.ShapeDtypeStruct((G, Lout, ND), jnp.float32),
        grid_spec=grid_spec,
        compiler_params=pltpu.CompilerParams(
            dimension_semantics=("parallel",),
            vmem_limit_bytes=vmem_limit,
        ),
    )

    def apply(x):
        assert x.shape == (B, C, L)
        # TODO(synk): at production sizes move this relayout into the kernel (per-b
        # lane concat of a (bt, C, L) block) or cache the re-laid-out tensor, to avoid
        # the extra XLA-side HBM round trip of the input/output.
        x_cnn = (x.astype(matmul_dtype)
                 .reshape(G, bt, C, L).transpose(0, 2, 1, 3).reshape(G, C, N))
        out = call(x_cnn, *consts)
        # (G, Lout, bt*Dout) -> (B, Lout, Dout)
        return out.reshape(G, Lout, bt, Dout).transpose(0, 2, 1, 3).reshape(B, Lout, Dout)

    return apply


def muti_task_projection_cnn(x, conv_w, conv_b, gamma, beta, Wd, bd, Wl, bl,
                             *, bt=None, matmul_dtype=jnp.bfloat16):
    """Convenience one-shot wrapper around make_muti_task_projection_cnn."""
    return make_muti_task_projection_cnn(
        conv_w, conv_b, gamma, beta, Wd, bd, Wl, bl,
        batch=x.shape[0], bt=bt, matmul_dtype=matmul_dtype)(x)


# ----------------------------------------------------------------------------
# 'mlp' branch (flatten + single Linear), tiled over (batch, K) with an f32
# accumulator so it pipelines and stays VMEM-safe at production sizes.
# ----------------------------------------------------------------------------
def _mlp_kernel(x_ref, w_ref, b_ref, o_ref, acc_ref):
    k = pl.program_id(1)

    @pl.when(k == 0)
    def _():
        acc_ref[...] = jnp.zeros_like(acc_ref)

    acc_ref[...] += jnp.dot(x_ref[...], w_ref[...], preferred_element_type=jnp.float32)

    @pl.when(k == pl.num_programs(1) - 1)
    def _():
        o_ref[...] = acc_ref[...] + b_ref[...]


def _pick_tile(n, cap, align):
    """Largest divisor of n that is <= cap and a multiple of `align` (else n itself)."""
    if n <= cap:
        return n
    best = None
    for d in range(align, cap + 1, align):
        if n % d == 0:
            best = d
    return best if best is not None else n


def muti_task_projection_mlp(x, Wm, bm, *, matmul_dtype=jnp.bfloat16,
                             tile_b=256, tile_k=512):
    """x: (B, input_len, input_dims). Wm: (dim_out, dim_in) PyTorch layout, bm: (dim_out,)."""
    B = x.shape[0]
    dim_out, dim_in = Wm.shape
    xf = x.reshape(B, -1).astype(matmul_dtype)
    Wt = Wm.T.astype(matmul_dtype)                 # (dim_in, dim_out)
    b2 = bm.astype(jnp.float32)[None, :]           # (1, dim_out)
    tb = _pick_tile(B, tile_b, 8)
    tk = _pick_tile(dim_in, tile_k, 128)
    grid = (B // tb, dim_in // tk)
    return pl.pallas_call(
        _mlp_kernel,
        out_shape=jax.ShapeDtypeStruct((B, dim_out), jnp.float32),
        grid_spec=pltpu.PrefetchScalarGridSpec(
            num_scalar_prefetch=0,
            grid=grid,
            in_specs=[
                pl.BlockSpec((tb, tk), lambda i, k: (i, k)),
                pl.BlockSpec((tk, dim_out), lambda i, k: (k, 0)),
                pl.BlockSpec((1, dim_out), lambda i, k: (0, 0)),
            ],
            out_specs=pl.BlockSpec((tb, dim_out), lambda i, k: (i, 0)),
            scratch_shapes=[pltpu.VMEM((tb, dim_out), jnp.float32)],
        ),
        compiler_params=pltpu.CompilerParams(
            dimension_semantics=("parallel", "arbitrary")),
    )(xf, Wt, b2)


# ----------------------------------------------------------------------------
# Pure-JAX references (for correctness check only)
# ----------------------------------------------------------------------------
def _conv1d_ref(h, w, b):  # h (B,C,L), w (C,C,3), b (C,)
    L = h.shape[-1]
    pad = jnp.pad(h, ((0, 0), (0, 0), (1, 1)))
    out = b[None, :, None]
    for k in range(3):
        out = out + jnp.einsum('oi,bil->bol', w[:, :, k], pad[:, :, k:k + L])
    return out


def ref_cnn(x, conv_w, conv_b, gamma, beta, Wd, bd, Wl, bl):
    def res_block(h, i):
        r = jax.nn.relu(_conv1d_ref(h, conv_w[2 * i], conv_b[2 * i]))
        r = _conv1d_ref(r, conv_w[2 * i + 1], conv_b[2 * i + 1])
        return h + r
    h = x
    h = res_block(h, 0)
    h = res_block(h, 1)
    h = jax.nn.relu(h)
    h = res_block(h, 2)
    h = res_block(h, 3)
    h = h + x
    mu = jnp.mean(h, axis=-1, keepdims=True)
    var = jnp.mean((h - mu) ** 2, axis=-1, keepdims=True)
    h = (h - mu) / jnp.sqrt(var + LN_EPS) * gamma + beta
    o1 = jnp.einsum('bcl,dl->bcd', h, Wd) + bd                   # (B, C, Dout)
    out = jnp.einsum('bcd,lc->bld', o1, Wl) + bl[None, :, None]  # (B, Lout, Dout)
    return out


def ref_mlp(x, Wm, bm):
    xf = x.reshape(x.shape[0], -1)
    return xf @ Wm.T + bm


if __name__ == "__main__":
    B, input_len, input_dims = 8, 8, 32
    output_len, output_dims = 4, 16

    keys = jax.random.split(jax.random.PRNGKey(0), 12)
    x = jax.random.normal(keys[0], (B, input_len, input_dims), jnp.float32)

    # 'cnn' branch parameters (4 res blocks -> 8 Conv1d layers)
    conv_w = 0.1 * jax.random.normal(keys[1], (8, input_len, input_len, 3), jnp.float32)
    conv_b = 0.1 * jax.random.normal(keys[2], (8, input_len), jnp.float32)
    gamma = 1.0 + 0.1 * jax.random.normal(keys[3], (input_dims,), jnp.float32)
    beta = 0.1 * jax.random.normal(keys[4], (input_dims,), jnp.float32)
    Wd = 0.1 * jax.random.normal(keys[5], (output_dims, input_dims), jnp.float32)
    bd = 0.1 * jax.random.normal(keys[6], (output_dims,), jnp.float32)
    Wl = 0.1 * jax.random.normal(keys[7], (output_len, input_len), jnp.float32)
    bl = 0.1 * jax.random.normal(keys[8], (output_len,), jnp.float32)

    # 'mlp' branch parameters
    dim_in = input_dims * input_len
    dim_out = output_dims * output_len
    Wm = 0.02 * jax.random.normal(keys[9], (dim_out, dim_in), jnp.float32)
    bm = 0.02 * jax.random.normal(keys[10], (dim_out,), jnp.float32)

    ref_c = ref_cnn(x, conv_w, conv_b, gamma, beta, Wd, bd, Wl, bl)
    ref_m = ref_mlp(x, Wm, bm)

    # --- 'cnn' path, f32 matmuls, auto batch tile (bt=4 -> 2 grid steps) ---
    proj_f32 = make_muti_task_projection_cnn(conv_w, conv_b, gamma, beta, Wd, bd, Wl, bl,
                                             batch=B, matmul_dtype=jnp.float32)
    out_cnn = jax.block_until_ready(proj_f32(x))
    assert out_cnn.shape == (B, output_len, output_dims)
    assert jnp.allclose(out_cnn, ref_c, rtol=2e-4, atol=2e-4), "cnn (f32) mismatch"

    # --- 'cnn' path, f32, single lane-packed tile over the whole batch (1 grid step) ---
    out_cnn1 = jax.block_until_ready(
        muti_task_projection_cnn(x, conv_w, conv_b, gamma, beta, Wd, bd, Wl, bl,
                                 bt=B, matmul_dtype=jnp.float32))
    assert jnp.allclose(out_cnn1, ref_c, rtol=2e-4, atol=2e-4), "cnn (f32, bt=B) mismatch"

    # --- 'cnn' path, bf16 matmul operands (default) -- loose-tolerance smoke check ---
    out_cnn_bf16 = jax.block_until_ready(
        muti_task_projection_cnn(x, conv_w, conv_b, gamma, beta, Wd, bd, Wl, bl))
    assert out_cnn_bf16.shape == (B, output_len, output_dims)
    assert jnp.allclose(out_cnn_bf16, ref_c, rtol=1e-1, atol=1e-1), "cnn (bf16) mismatch"

    # --- 'mlp' path ---
    out_mlp = jax.block_until_ready(
        muti_task_projection_mlp(x, Wm, bm, matmul_dtype=jnp.float32))
    assert out_mlp.shape == (B, dim_out)
    assert jnp.allclose(out_mlp, ref_m, rtol=2e-4, atol=2e-4), "mlp (f32) mismatch"

    out_mlp_bf16 = jax.block_until_ready(muti_task_projection_mlp(x, Wm, bm))
    assert jnp.allclose(out_mlp_bf16, ref_m, rtol=1e-1, atol=1e-1), "mlp (bf16) mismatch"

    print("KERNEL_OK")
</pallas_src>

<mosaic_0001>
module attributes {stable_mosaic.version = 11 : i64} {
  func.func @_cnn_kernel(%arg0: i32, %arg1: memref<1x8x128xf32, #tpu.memory_space<vmem>>, %arg2: memref<8x8x24xf32, #tpu.memory_space<vmem>>, %arg3: memref<8x8x1xf32, #tpu.memory_space<vmem>>, %arg4: memref<1x128xf32, #tpu.memory_space<vmem>>, %arg5: memref<1x128xf32, #tpu.memory_space<vmem>>, %arg6: memref<128x4xf32, #tpu.memory_space<vmem>>, %arg7: memref<4x128xf32, #tpu.memory_space<vmem>>, %arg8: memref<128x64xf32, #tpu.memory_space<vmem>>, %arg9: memref<1x64xf32, #tpu.memory_space<vmem>>, %arg10: memref<4x8xf32, #tpu.memory_space<vmem>>, %arg11: memref<4x1xf32, #tpu.memory_space<vmem>>, %arg12: memref<1x4x64xf32, #tpu.memory_space<vmem>>) attributes {dimension_semantics = [#tpu.dimension_semantics<parallel>], iteration_bounds = array<i64: 2>, scalar_prefetch = 0 : i64, scratch_operands = 0 : i64, tpu.core_type = #tpu.core_type<tc>, window_params = [{transform_indices = @transform_0, window_bounds = array<i64: 1, 8, 128>}, {pipeline_mode = #tpu.pipeline_mode<synchronous>, transform_indices = @transform_1, window_bounds = array<i64: 8, 8, 24>}, {pipeline_mode = #tpu.pipeline_mode<synchronous>, transform_indices = @transform_2, window_bounds = array<i64: 8, 8, 1>}, {pipeline_mode = #tpu.pipeline_mode<synchronous>, transform_indices = @transform_3, window_bounds = array<i64: 1, 128>}, {pipeline_mode = #tpu.pipeline_mode<synchronous>, transform_indices = @transform_4, window_bounds = array<i64: 1, 128>}, {pipeline_mode = #tpu.pipeline_mode<synchronous>, transform_indices = @transform_5, window_bounds = array<i64: 128, 4>}, {pipeline_mode = #tpu.pipeline_mode<synchronous>, transform_indices = @transform_6, window_bounds = array<i64: 4, 128>}, {pipeline_mode = #tpu.pipeline_mode<synchronous>, transform_indices = @transform_7, window_bounds = array<i64: 128, 64>}, {pipeline_mode = #tpu.pipeline_mode<synchronous>, transform_indices = @transform_8, window_bounds = array<i64: 1, 64>}, {pipeline_mode = #tpu.pipeline_mode<synchronous>, transform_indices = @transform_9, window_bounds = array<i64: 4, 8>}, {pipeline_mode = #tpu.pipeline_mode<synchronous>, transform_indices = @transform_10, window_bounds = array<i64: 4, 1>}, {transform_indices = @transform_11, window_bounds = array<i64: 1, 4, 64>}]} {
    %c0 = arith.constant 0 : index
    %c0_0 = arith.constant 0 : index
    %c0_1 = arith.constant 0 : index
    %0 = vector.load %arg1[%c0, %c0_0, %c0_1] : memref<1x8x128xf32, #tpu.memory_space<vmem>>, vector<1x8x128xf32>
    %1 = vector.shape_cast %0 : vector<1x8x128xf32> to vector<8x128xf32>
    %2 = tpu.iota {dimensions = array<i32: 1>} : vector<1x128xi32>
    %c32_i32 = arith.constant 32 : i32
    %c0_i32 = arith.constant 0 : i32
    %3 = arith.cmpi eq, %c32_i32, %c0_i32 : i32
    %c1_i32 = arith.constant 1 : i32
    %4 = arith.select %3, %c1_i32, %c32_i32 : i32
    %5 = vector.broadcast %4 : i32 to vector<1x128xi32>
    %6 = arith.remsi %2, %5 : vector<1x128xi32>
    %c0_i32_2 = arith.constant 0 : i32
    %7 = vector.broadcast %c0_i32_2 : i32 to vector<1x128xi32>
    %8 = arith.cmpi ne, %6, %7 : vector<1x128xi32>
    %c0_i32_3 = arith.constant 0 : i32
    %9 = vector.broadcast %c0_i32_3 : i32 to vector<1x128xi32>
    %10 = arith.cmpi slt, %6, %9 : vector<1x128xi32>
    %c0_i32_4 = arith.constant 0 : i32
    %11 = arith.cmpi slt, %4, %c0_i32_4 : i32
    %12 = vector.broadcast %11 : i1 to vector<1x128xi1>
    %13 = vector.broadcast %12 : vector<1x128xi1> to vector<1x128xi1>
    %14 = arith.xori %10, %13 : vector<1x128xi1>
    %15 = arith.andi %14, %8 : vector<1x128xi1>
    %16 = vector.broadcast %4 : i32 to vector<1x128xi32>
    %17 = arith.addi %6, %16 : vector<1x128xi32>
    %18 = arith.select %15, %17, %6 : vector<1x128xi1>, vector<1x128xi32>
    %c0_i32_5 = arith.constant 0 : i32
    %19 = vector.broadcast %c0_i32_5 : i32 to vector<1x128xi32>
    %20 = arith.cmpi ne, %18, %19 : vector<1x128xi32>
    %c31_i32 = arith.constant 31 : i32
    %21 = vector.broadcast %c31_i32 : i32 to vector<1x128xi32>
    %22 = arith.cmpi ne, %18, %21 : vector<1x128xi32>
    %c1_i32_6 = arith.constant 1 : i32
    %23 = tpu.dynamic_rotate %1 by %c1_i32_6 dim 1 : vector<8x128xf32>, i32 -> vector<8x128xf32>
    %cst = arith.constant 0.000000e+00 : f32
    %24 = vector.shape_cast %20 : vector<1x128xi1> to vector<1x128xi1>
    %25 = vector.broadcast %24 : vector<1x128xi1> to vector<8x128xi1>
    %26 = vector.broadcast %cst : f32 to vector<8x128xf32>
    %27 = arith.select %25, %23, %26 : vector<8x128xi1>, vector<8x128xf32>
    %c127_i32 = arith.constant 127 : i32
    %28 = tpu.dynamic_rotate %1 by %c127_i32 dim 1 : vector<8x128xf32>, i32 -> vector<8x128xf32>
    %cst_7 = arith.constant 0.000000e+00 : f32
    %29 = vector.shape_cast %22 : vector<1x128xi1> to vector<1x128xi1>
    %30 = vector.broadcast %29 : vector<1x128xi1> to vector<8x128xi1>
    %31 = vector.broadcast %cst_7 : f32 to vector<8x128xf32>
    %32 = arith.select %30, %28, %31 : vector<8x128xi1>, vector<8x128xf32>
    %33 = tpu.concatenate %27, %1, %32 in 0 : vector<8x128xf32>, vector<8x128xf32>, vector<8x128xf32> -> vector<24x128xf32>
    %c0_8 = arith.constant 0 : index
    %c0_9 = arith.constant 0 : index
    %c0_10 = arith.constant 0 : index
    %34 = vector.load %arg2[%c0_8, %c0_9, %c0_10] : memref<8x8x24xf32, #tpu.memory_space<vmem>>, vector<1x8x24xf32>
    %35 = vector.shape_cast %34 : vector<1x8x24xf32> to vector<8x24xf32>
    %cst_11 = arith.constant dense<0.000000e+00> : vector<8x128xf32>
    %36 = tpu.matmul %35, %33, %cst_11 {dimension_numbers = #tpu.dot_dimension_numbers<[1], [0], [0], [1], [0, 0, 1, 1], [], []>} : vector<8x24xf32>, vector<24x128xf32>, vector<8x128xf32> -> vector<8x128xf32>
    %c0_12 = arith.constant 0 : index
    %c0_13 = arith.constant 0 : index
    %c0_14 = arith.constant 0 : index
    %37 = vector.load %arg3[%c0_12, %c0_13, %c0_14] : memref<8x8x1xf32, #tpu.memory_space<vmem>>, vector<1x8x1xf32>
    %38 = vector.shape_cast %37 : vector<1x8x1xf32> to vector<8x1xf32>
    %39 = vector.broadcast %38 : vector<8x1xf32> to vector<8x128xf32>
    %40 = arith.addf %36, %39 : vector<8x128xf32>
    %cst_15 = arith.constant 0.000000e+00 : f32
    %41 = vector.broadcast %cst_15 : f32 to vector<8x128xf32>
    %42 = arith.maximumf %40, %41 : vector<8x128xf32>
    %c1_i32_16 = arith.constant 1 : i32
    %43 = tpu.dynamic_rotate %42 by %c1_i32_16 dim 1 : vector<8x128xf32>, i32 -> vector<8x128xf32>
    %cst_17 = arith.constant 0.000000e+00 : f32
    %44 = vector.shape_cast %20 : vector<1x128xi1> to vector<1x128xi1>
    %45 = vector.broadcast %44 : vector<1x128xi1> to vector<8x128xi1>
    %46 = vector.broadcast %cst_17 : f32 to vector<8x128xf32>
    %47 = arith.select %45, %43, %46 : vector<8x128xi1>, vector<8x128xf32>
    %c127_i32_18 = arith.constant 127 : i32
    %48 = tpu.dynamic_rotate %42 by %c127_i32_18 dim 1 : vector<8x128xf32>, i32 -> vector<8x128xf32>
    %cst_19 = arith.constant 0.000000e+00 : f32
    %49 = vector.shape_cast %22 : vector<1x128xi1> to vector<1x128xi1>
    %50 = vector.broadcast %49 : vector<1x128xi1> to vector<8x128xi1>
    %51 = vector.broadcast %cst_19 : f32 to vector<8x128xf32>
    %52 = arith.select %50, %48, %51 : vector<8x128xi1>, vector<8x128xf32>
    %53 = tpu.concatenate %47, %42, %52 in 0 : vector<8x128xf32>, vector<8x128xf32>, vector<8x128xf32> -> vector<24x128xf32>
    %c1 = arith.constant 1 : index
    %c0_20 = arith.constant 0 : index
    %c0_21 = arith.constant 0 : index
    %54 = vector.load %arg2[%c1, %c0_20, %c0_21] : memref<8x8x24xf32, #tpu.memory_space<vmem>>, vector<1x8x24xf32>
    %55 = vector.shape_cast %54 : vector<1x8x24xf32> to vector<8x24xf32>
    %cst_22 = arith.constant dense<0.000000e+00> : vector<8x128xf32>
    %56 = tpu.matmul %55, %53, %cst_22 {dimension_numbers = #tpu.dot_dimension_numbers<[1], [0], [0], [1], [0, 0, 1, 1], [], []>} : vector<8x24xf32>, vector<24x128xf32>, vector<8x128xf32> -> vector<8x128xf32>
    %c1_23 = arith.constant 1 : index
    %c0_24 = arith.constant 0 : index
    %c0_25 = arith.constant 0 : index
    %57 = vector.load %arg3[%c1_23, %c0_24, %c0_25] : memref<8x8x1xf32, #tpu.memory_space<vmem>>, vector<1x8x1xf32>
    %58 = vector.shape_cast %57 : vector<1x8x1xf32> to vector<8x1xf32>
    %59 = vector.broadcast %58 : vector<8x1xf32> to vector<8x128xf32>
    %60 = arith.addf %56, %59 : vector<8x128xf32>
    %61 = arith.addf %1, %60 : vector<8x128xf32>
    %c1_i32_26 = arith.constant 1 : i32
    %62 = tpu.dynamic_rotate %61 by %c1_i32_26 dim 1 : vector<8x128xf32>, i32 -> vector<8x128xf32>
    %cst_27 = arith.constant 0.000000e+00 : f32
    %63 = vector.shape_cast %20 : vector<1x128xi1> to vector<1x128xi1>
    %64 = vector.broadcast %63 : vector<1x128xi1> to vector<8x128xi1>
    %65 = vector.broadcast %cst_27 : f32 to vector<8x128xf32>
    %66 = arith.select %64, %62, %65 : vector<8x128xi1>, vector<8x128xf32>
    %c127_i32_28 = arith.constant 127 : i32
    %67 = tpu.dynamic_rotate %61 by %c127_i32_28 dim 1 : vector<8x128xf32>, i32 -> vector<8x128xf32>
    %cst_29 = arith.constant 0.000000e+00 : f32
    %68 = vector.shape_cast %22 : vector<1x128xi1> to vector<1x128xi1>
    %69 = vector.broadcast %68 : vector<1x128xi1> to vector<8x128xi1>
    %70 = vector.broadcast %cst_29 : f32 to vector<8x128xf32>
    %71 = arith.select %69, %67, %70 : vector<8x128xi1>, vector<8x128xf32>
    %72 = tpu.concatenate %66, %61, %71 in 0 : vector<8x128xf32>, vector<8x128xf32>, vector<8x128xf32> -> vector<24x128xf32>
    %c2 = arith.constant 2 : index
    %c0_30 = arith.constant 0 : index
    %c0_31 = arith.constant 0 : index
    %73 = vector.load %arg2[%c2, %c0_30, %c0_31] : memref<8x8x24xf32, #tpu.memory_space<vmem>>, vector<1x8x24xf32>
    %74 = vector.shape_cast %73 : vector<1x8x24xf32> to vector<8x24xf32>
    %cst_32 = arith.constant dense<0.000000e+00> : vector<8x128xf32>
    %75 = tpu.matmul %74, %72, %cst_32 {dimension_numbers = #tpu.dot_dimension_numbers<[1], [0], [0], [1], [0, 0, 1, 1], [], []>} : vector<8x24xf32>, vector<24x128xf32>, vector<8x128xf32> -> vector<8x128xf32>
    %c2_33 = arith.constant 2 : index
    %c0_34 = arith.constant 0 : index
    %c0_35 = arith.constant 0 : index
    %76 = vector.load %arg3[%c2_33, %c0_34, %c0_35] : memref<8x8x1xf32, #tpu.memory_space<vmem>>, vector<1x8x1xf32>
    %77 = vector.shape_cast %76 : vector<1x8x1xf32> to vector<8x1xf32>
    %78 = vector.broadcast %77 : vector<8x1xf32> to vector<8x128xf32>
    %79 = arith.addf %75, %78 : vector<8x128xf32>
    %cst_36 = arith.constant 0.000000e+00 : f32
    %80 = vector.broadcast %cst_36 : f32 to vector<8x128xf32>
    %81 = arith.maximumf %79, %80 : vector<8x128xf32>
    %c1_i32_37 = arith.constant 1 : i32
    %82 = tpu.dynamic_rotate %81 by %c1_i32_37 dim 1 : vector<8x128xf32>, i32 -> vector<8x128xf32>
    %cst_38 = arith.constant 0.000000e+00 : f32
    %83 = vector.shape_cast %20 : vector<1x128xi1> to vector<1x128xi1>
    %84 = vector.broadcast %83 : vector<1x128xi1> to vector<8x128xi1>
    %85 = vector.broadcast %cst_38 : f32 to vector<8x128xf32>
    %86 = arith.select %84, %82, %85 : vector<8x128xi1>, vector<8x128xf32>
    %c127_i32_39 = arith.constant 127 : i32
    %87 = tpu.dynamic_rotate %81 by %c127_i32_39 dim 1 : vector<8x128xf32>, i32 -> vector<8x128xf32>
    %cst_40 = arith.constant 0.000000e+00 : f32
    %88 = vector.shape_cast %22 : vector<1x128xi1> to vector<1x128xi1>
    %89 = vector.broadcast %88 : vector<1x128xi1> to vector<8x128xi1>
    %90 = vector.broadcast %cst_40 : f32 to vector<8x128xf32>
    %91 = arith.select %89, %87, %90 : vector<8x128xi1>, vector<8x128xf32>
    %92 = tpu.concatenate %86, %81, %91 in 0 : vector<8x128xf32>, vector<8x128xf32>, vector<8x128xf32> -> vector<24x128xf32>
    %c3 = arith.constant 3 : index
    %c0_41 = arith.constant 0 : index
    %c0_42 = arith.constant 0 : index
    %93 = vector.load %arg2[%c3, %c0_41, %c0_42] : memref<8x8x24xf32, #tpu.memory_space<vmem>>, vector<1x8x24xf32>
    %94 = vector.shape_cast %93 : vector<1x8x24xf32> to vector<8x24xf32>
    %cst_43 = arith.constant dense<0.000000e+00> : vector<8x128xf32>
    %95 = tpu.matmul %94, %92, %cst_43 {dimension_numbers = #tpu.dot_dimension_numbers<[1], [0], [0], [1], [0, 0, 1, 1], [], []>} : vector<8x24xf32>, vector<24x128xf32>, vector<8x128xf32> -> vector<8x128xf32>
    %c3_44 = arith.constant 3 : index
    %c0_45 = arith.constant 0 : index
    %c0_46 = arith.constant 0 : index
    %96 = vector.load %arg3[%c3_44, %c0_45, %c0_46] : memref<8x8x1xf32, #tpu.memory_space<vmem>>, vector<1x8x1xf32>
    %97 = vector.shape_cast %96 : vector<1x8x1xf32> to vector<8x1xf32>
    %98 = vector.broadcast %97 : vector<8x1xf32> to vector<8x128xf32>
    %99 = arith.addf %95, %98 : vector<8x128xf32>
    %100 = arith.addf %61, %99 : vector<8x128xf32>
    %cst_47 = arith.constant 0.000000e+00 : f32
    %101 = vector.broadcast %cst_47 : f32 to vector<8x128xf32>
    %102 = arith.maximumf %100, %101 : vector<8x128xf32>
    %c1_i32_48 = arith.constant 1 : i32
    %103 = tpu.dynamic_rotate %102 by %c1_i32_48 dim 1 : vector<8x128xf32>, i32 -> vector<8x128xf32>
    %cst_49 = arith.constant 0.000000e+00 : f32
    %104 = vector.shape_cast %20 : vector<1x128xi1> to vector<1x128xi1>
    %105 = vector.broadcast %104 : vector<1x128xi1> to vector<8x128xi1>
    %106 = vector.broadcast %cst_49 : f32 to vector<8x128xf32>
    %107 = arith.select %105, %103, %106 : vector<8x128xi1>, vector<8x128xf32>
    %c127_i32_50 = arith.constant 127 : i32
    %108 = tpu.dynamic_rotate %102 by %c127_i32_50 dim 1 : vector<8x128xf32>, i32 -> vector<8x128xf32>
    %cst_51 = arith.constant 0.000000e+00 : f32
    %109 = vector.shape_cast %22 : vector<1x128xi1> to vector<1x128xi1>
    %110 = vector.broadcast %109 : vector<1x128xi1> to vector<8x128xi1>
    %111 = vector.broadcast %cst_51 : f32 to vector<8x128xf32>
    %112 = arith.select %110, %108, %111 : vector<8x128xi1>, vector<8x128xf32>
    %113 = tpu.concatenate %107, %102, %112 in 0 : vector<8x128xf32>, vector<8x128xf32>, vector<8x128xf32> -> vector<24x128xf32>
    %c4 = arith.constant 4 : index
    %c0_52 = arith.constant 0 : index
    %c0_53 = arith.constant 0 : index
    %114 = vector.load %arg2[%c4, %c0_52, %c0_53] : memref<8x8x24xf32, #tpu.memory_space<vmem>>, vector<1x8x24xf32>
    %115 = vector.shape_cast %114 : vector<1x8x24xf32> to vector<8x24xf32>
    %cst_54 = arith.constant dense<0.000000e+00> : vector<8x128xf32>
    %116 = tpu.matmul %115, %113, %cst_54 {dimension_numbers = #tpu.dot_dimension_numbers<[1], [0], [0], [1], [0, 0, 1, 1], [], []>} : vector<8x24xf32>, vector<24x128xf32>, vector<8x128xf32> -> vector<8x128xf32>
    %c4_55 = arith.constant 4 : index
    %c0_56 = arith.constant 0 : index
    %c0_57 = arith.constant 0 : index
    %117 = vector.load %arg3[%c4_55, %c0_56, %c0_57] : memref<8x8x1xf32, #tpu.memory_space<vmem>>, vector<1x8x1xf32>
    %118 = vector.shape_cast %117 : vector<1x8x1xf32> to vector<8x1xf32>
    %119 = vector.broadcast %118 : vector<8x1xf32> to vector<8x128xf32>
    %120 = arith.addf %116, %119 : vector<8x128xf32>
    %cst_58 = arith.constant 0.000000e+00 : f32
    %121 = vector.broadcast %cst_58 : f32 to vector<8x128xf32>
    %122 = arith.maximumf %120, %121 : vector<8x128xf32>
    %c1_i32_59 = arith.constant 1 : i32
    %123 = tpu.dynamic_rotate %122 by %c1_i32_59 dim 1 : vector<8x128xf32>, i32 -> vector<8x128xf32>
    %cst_60 = arith.constant 0.000000e+00 : f32
    %124 = vector.shape_cast %20 : vector<1x128xi1> to vector<1x128xi1>
    %125 = vector.broadcast %124 : vector<1x128xi1> to vector<8x128xi1>
    %126 = vector.broadcast %cst_60 : f32 to vector<8x128xf32>
    %127 = arith.select %125, %123, %126 : vector<8x128xi1>, vector<8x128xf32>
    %c127_i32_61 = arith.constant 127 : i32
    %128 = tpu.dynamic_rotate %122 by %c127_i32_61 dim 1 : vector<8x128xf32>, i32 -> vector<8x128xf32>
    %cst_62 = arith.constant 0.000000e+00 : f32
    %129 = vector.shape_cast %22 : vector<1x128xi1> to vector<1x128xi1>
    %130 = vector.broadcast %129 : vector<1x128xi1> to vector<8x128xi1>
    %131 = vector.broadcast %cst_62 : f32 to vector<8x128xf32>
    %132 = arith.select %130, %128, %131 : vector<8x128xi1>, vector<8x128xf32>
    %133 = tpu.concatenate %127, %122, %132 in 0 : vector<8x128xf32>, vector<8x128xf32>, vector<8x128xf32> -> vector<24x128xf32>
    %c5 = arith.constant 5 : index
    %c0_63 = arith.constant 0 : index
    %c0_64 = arith.constant 0 : index
    %134 = vector.load %arg2[%c5, %c0_63, %c0_64] : memref<8x8x24xf32, #tpu.memory_space<vmem>>, vector<1x8x24xf32>
    %135 = vector.shape_cast %134 : vector<1x8x24xf32> to vector<8x24xf32>
    %cst_65 = arith.constant dense<0.000000e+00> : vector<8x128xf32>
    %136 = tpu.matmul %135, %133, %cst_65 {dimension_numbers = #tpu.dot_dimension_numbers<[1], [0], [0], [1], [0, 0, 1, 1], [], []>} : vector<8x24xf32>, vector<24x128xf32>, vector<8x128xf32> -> vector<8x128xf32>
    %c5_66 = arith.constant 5 : index
    %c0_67 = arith.constant 0 : index
    %c0_68 = arith.constant 0 : index
    %137 = vector.load %arg3[%c5_66, %c0_67, %c0_68] : memref<8x8x1xf32, #tpu.memory_space<vmem>>, vector<1x8x1xf32>
    %138 = vector.shape_cast %137 : vector<1x8x1xf32> to vector<8x1xf32>
    %139 = vector.broadcast %138 : vector<8x1xf32> to vector<8x128xf32>
    %140 = arith.addf %136, %139 : vector<8x128xf32>
    %141 = arith.addf %102, %140 : vector<8x128xf32>
    %c1_i32_69 = arith.constant 1 : i32
    %142 = tpu.dynamic_rotate %141 by %c1_i32_69 dim 1 : vector<8x128xf32>, i32 -> vector<8x128xf32>
    %cst_70 = arith.constant 0.000000e+00 : f32
    %143 = vector.shape_cast %20 : vector<1x128xi1> to vector<1x128xi1>
    %144 = vector.broadcast %143 : vector<1x128xi1> to vector<8x128xi1>
    %145 = vector.broadcast %cst_70 : f32 to vector<8x128xf32>
    %146 = arith.select %144, %142, %145 : vector<8x128xi1>, vector<8x128xf32>
    %c127_i32_71 = arith.constant 127 : i32
    %147 = tpu.dynamic_rotate %141 by %c127_i32_71 dim 1 : vector<8x128xf32>, i32 -> vector<8x128xf32>
    %cst_72 = arith.constant 0.000000e+00 : f32
    %148 = vector.shape_cast %22 : vector<1x128xi1> to vector<1x128xi1>
    %149 = vector.broadcast %148 : vector<1x128xi1> to vector<8x128xi1>
    %150 = vector.broadcast %cst_72 : f32 to vector<8x128xf32>
    %151 = arith.select %149, %147, %150 : vector<8x128xi1>, vector<8x128xf32>
    %152 = tpu.concatenate %146, %141, %151 in 0 : vector<8x128xf32>, vector<8x128xf32>, vector<8x128xf32> -> vector<24x128xf32>
    %c6 = arith.constant 6 : index
    %c0_73 = arith.constant 0 : index
    %c0_74 = arith.constant 0 : index
    %153 = vector.load %arg2[%c6, %c0_73, %c0_74] : memref<8x8x24xf32, #tpu.memory_space<vmem>>, vector<1x8x24xf32>
    %154 = vector.shape_cast %153 : vector<1x8x24xf32> to vector<8x24xf32>
    %cst_75 = arith.constant dense<0.000000e+00> : vector<8x128xf32>
    %155 = tpu.matmul %154, %152, %cst_75 {dimension_numbers = #tpu.dot_dimension_numbers<[1], [0], [0], [1], [0, 0, 1, 1], [], []>} : vector<8x24xf32>, vector<24x128xf32>, vector<8x128xf32> -> vector<8x128xf32>
    %c6_76 = arith.constant 6 : index
    %c0_77 = arith.constant 0 : index
    %c0_78 = arith.constant 0 : index
    %156 = vector.load %arg3[%c6_76, %c0_77, %c0_78] : memref<8x8x1xf32, #tpu.memory_space<vmem>>, vector<1x8x1xf32>
    %157 = vector.shape_cast %156 : vector<1x8x1xf32> to vector<8x1xf32>
    %158 = vector.broadcast %157 : vector<8x1xf32> to vector<8x128xf32>
    %159 = arith.addf %155, %158 : vector<8x128xf32>
    %cst_79 = arith.constant 0.000000e+00 : f32
    %160 = vector.broadcast %cst_79 : f32 to vector<8x128xf32>
    %161 = arith.maximumf %159, %160 : vector<8x128xf32>
    %c1_i32_80 = arith.constant 1 : i32
    %162 = tpu.dynamic_rotate %161 by %c1_i32_80 dim 1 : vector<8x128xf32>, i32 -> vector<8x128xf32>
    %cst_81 = arith.constant 0.000000e+00 : f32
    %163 = vector.shape_cast %20 : vector<1x128xi1> to vector<1x128xi1>
    %164 = vector.broadcast %163 : vector<1x128xi1> to vector<8x128xi1>
    %165 = vector.broadcast %cst_81 : f32 to vector<8x128xf32>
    %166 = arith.select %164, %162, %165 : vector<8x128xi1>, vector<8x128xf32>
    %c127_i32_82 = arith.constant 127 : i32
    %167 = tpu.dynamic_rotate %161 by %c127_i32_82 dim 1 : vector<8x128xf32>, i32 -> vector<8x128xf32>
    %cst_83 = arith.constant 0.000000e+00 : f32
    %168 = vector.shape_cast %22 : vector<1x128xi1> to vector<1x128xi1>
    %169 = vector.broadcast %168 : vector<1x128xi1> to vector<8x128xi1>
    %170 = vector.broadcast %cst_83 : f32 to vector<8x128xf32>
    %171 = arith.select %169, %167, %170 : vector<8x128xi1>, vector<8x128xf32>
    %172 = tpu.concatenate %166, %161, %171 in 0 : vector<8x128xf32>, vector<8x128xf32>, vector<8x128xf32> -> vector<24x128xf32>
    %c7 = arith.constant 7 : index
    %c0_84 = arith.constant 0 : index
    %c0_85 = arith.constant 0 : index
    %173 = vector.load %arg2[%c7, %c0_84, %c0_85] : memref<8x8x24xf32, #tpu.memory_space<vmem>>, vector<1x8x24xf32>
    %174 = vector.shape_cast %173 : vector<1x8x24xf32> to vector<8x24xf32>
    %cst_86 = arith.constant dense<0.000000e+00> : vector<8x128xf32>
    %175 = tpu.matmul %174, %172, %cst_86 {dimension_numbers = #tpu.dot_dimension_numbers<[1], [0], [0], [1], [0, 0, 1, 1], [], []>} : vector<8x24xf32>, vector<24x128xf32>, vector<8x128xf32> -> vector<8x128xf32>
    %c7_87 = arith.constant 7 : index
    %c0_88 = arith.constant 0 : index
    %c0_89 = arith.constant 0 : index
    %176 = vector.load %arg3[%c7_87, %c0_88, %c0_89] : memref<8x8x1xf32, #tpu.memory_space<vmem>>, vector<1x8x1xf32>
    %177 = vector.shape_cast %176 : vector<1x8x1xf32> to vector<8x1xf32>
    %178 = vector.broadcast %177 : vector<8x1xf32> to vector<8x128xf32>
    %179 = arith.addf %175, %178 : vector<8x128xf32>
    %180 = arith.addf %141, %179 : vector<8x128xf32>
    %181 = arith.addf %180, %1 : vector<8x128xf32>
    %182 = arith.mulf %181, %181 : vector<8x128xf32>
    %183 = tpu.concatenate %181, %182 in 0 : vector<8x128xf32>, vector<8x128xf32> -> vector<16x128xf32>
    %c0_90 = arith.constant 0 : index
    %c0_91 = arith.constant 0 : index
    %184 = vector.load %arg6[%c0_90, %c0_91] : memref<128x4xf32, #tpu.memory_space<vmem>>, vector<128x4xf32>
    %cst_92 = arith.constant dense<0.000000e+00> : vector<16x4xf32>
    %185 = tpu.matmul %183, %184, %cst_92 {dimension_numbers = #tpu.dot_dimension_numbers<[1], [0], [0], [1], [0, 0, 1, 1], [], []>} : vector<16x128xf32>, vector<128x4xf32>, vector<16x4xf32> -> vector<16x4xf32>
    %cst_93 = arith.constant 3.125000e-02 : f32
    %186 = vector.broadcast %cst_93 : f32 to vector<16x4xf32>
    %187 = arith.mulf %185, %186 : vector<16x4xf32>
    %c0_94 = arith.constant 0 : index
    %c0_95 = arith.constant 0 : index
    %188 = vector.load %arg7[%c0_94, %c0_95] : memref<4x128xf32, #tpu.memory_space<vmem>>, vector<4x128xf32>
    %cst_96 = arith.constant dense<0.000000e+00> : vector<16x128xf32>
    %189 = tpu.matmul %187, %188, %cst_96 {dimension_numbers = #tpu.dot_dimension_numbers<[1], [0], [0], [1], [0, 0, 1, 1], [], []>} : vector<16x4xf32>, vector<4x128xf32>, vector<16x128xf32> -> vector<16x128xf32>
    %190 = vector.extract_strided_slice %189 {offsets = [0, 0], sizes = [8, 128], strides = [1, 1]} : vector<16x128xf32> to vector<8x128xf32>
    %191 = vector.extract_strided_slice %189 {offsets = [8, 0], sizes = [8, 128], strides = [1, 1]} : vector<16x128xf32> to vector<8x128xf32>
    %192 = arith.mulf %190, %190 : vector<8x128xf32>
    %193 = arith.subf %191, %192 : vector<8x128xf32>
    %cst_97 = arith.constant 0.000000e+00 : f32
    %194 = vector.broadcast %cst_97 : f32 to vector<8x128xf32>
    %195 = arith.maximumf %193, %194 : vector<8x128xf32>
    %196 = arith.subf %181, %190 : vector<8x128xf32>
    %cst_98 = arith.constant 9.99999974E-6 : f32
    %197 = vector.broadcast %cst_98 : f32 to vector<8x128xf32>
    %198 = arith.addf %195, %197 : vector<8x128xf32>
    %199 = math.rsqrt %198 : vector<8x128xf32>
    %200 = arith.mulf %196, %199 : vector<8x128xf32>
    %c0_99 = arith.constant 0 : index
    %c0_100 = arith.constant 0 : index
    %201 = vector.load %arg4[%c0_99, %c0_100] : memref<1x128xf32, #tpu.memory_space<vmem>>, vector<1x128xf32>
    %202 = vector.broadcast %201 : vector<1x128xf32> to vector<8x128xf32>
    %203 = arith.mulf %200, %202 : vector<8x128xf32>
    %c0_101 = arith.constant 0 : index
    %c0_102 = arith.constant 0 : index
    %204 = vector.load %arg5[%c0_101, %c0_102] : memref<1x128xf32, #tpu.memory_space<vmem>>, vector<1x128xf32>
    %205 = vector.broadcast %204 : vector<1x128xf32> to vector<8x128xf32>
    %206 = arith.addf %203, %205 : vector<8x128xf32>
    %c0_103 = arith.constant 0 : index
    %c0_104 = arith.constant 0 : index
    %207 = vector.load %arg8[%c0_103, %c0_104] : memref<128x64xf32, #tpu.memory_space<vmem>>, vector<128x64xf32>
    %cst_105 = arith.constant dense<0.000000e+00> : vector<8x64xf32>
    %208 = tpu.matmul %206, %207, %cst_105 {dimension_numbers = #tpu.dot_dimension_numbers<[1], [0], [0], [1], [0, 0, 1, 1], [], []>} : vector<8x128xf32>, vector<128x64xf32>, vector<8x64xf32> -> vector<8x64xf32>
    %c0_106 = arith.constant 0 : index
    %c0_107 = arith.constant 0 : index
    %209 = vector.load %arg9[%c0_106, %c0_107] : memref<1x64xf32, #tpu.memory_space<vmem>>, vector<1x64xf32>
    %210 = vector.broadcast %209 : vector<1x64xf32> to vector<8x64xf32>
    %211 = arith.addf %208, %210 : vector<8x64xf32>
    %c0_108 = arith.constant 0 : index
    %c0_109 = arith.constant 0 : index
    %212 = vector.load %arg10[%c0_108, %c0_109] : memref<4x8xf32, #tpu.memory_space<vmem>>, vector<4x8xf32>
    %cst_110 = arith.constant dense<0.000000e+00> : vector<4x64xf32>
    %213 = tpu.matmul %212, %211, %cst_110 {dimension_numbers = #tpu.dot_dimension_numbers<[1], [0], [0], [1], [0, 0, 1, 1], [], []>} : vector<4x8xf32>, vector<8x64xf32>, vector<4x64xf32> -> vector<4x64xf32>
    %c0_111 = arith.constant 0 : index
    %c0_112 = arith.constant 0 : index
    %214 = vector.load %arg11[%c0_111, %c0_112] : memref<4x1xf32, #tpu.memory_space<vmem>>, vector<4x1xf32>
    %215 = vector.broadcast %214 : vector<4x1xf32> to vector<4x64xf32>
    %216 = arith.addf %213, %215 : vector<4x64xf32>
    %c0_113 = arith.constant 0 : index
    %c0_114 = arith.constant 0 : index
    %c0_115 = arith.constant 0 : index
    %217 = vector.load %arg12[%c0_113, %c0_114, %c0_115] : memref<1x4x64xf32, #tpu.memory_space<vmem>>, vector<1x4x64xf32>
    %218 = vector.shape_cast %217 : vector<1x4x64xf32> to vector<4x64xf32>
    %219 = vector.shape_cast %216 : vector<4x64xf32> to vector<1x4x64xf32>
    tpu.vector_store %arg12[%c0_113, %c0_114, %c0_115], %219 {strides = array<i32>} : memref<1x4x64xf32, #tpu.memory_space<vmem>>, vector<1x4x64xf32>,
    return
  }
  func.func @transform_0(%arg0: i32) -> (i32, i32, i32) {
    %c0_i32 = arith.constant 0 : i32
    %c0_i32_0 = arith.constant 0 : i32
    %c0_i32_1 = arith.constant 0 : i32
    return %arg0, %c0_i32, %c0_i32_0 : i32, i32, i32
  }
  func.func @transform_1(%arg0: i32) -> (i32, i32, i32) {
    %c0_i32 = arith.constant 0 : i32
    %c0_i32_0 = arith.constant 0 : i32
    %c0_i32_1 = arith.constant 0 : i32
    %c0_i32_2 = arith.constant 0 : i32
    return %c0_i32, %c0_i32_0, %c0_i32_1 : i32, i32, i32
  }
  func.func @transform_2(%arg0: i32) -> (i32, i32, i32) {
    %c0_i32 = arith.constant 0 : i32
    %c0_i32_0 = arith.constant 0 : i32
    %c0_i32_1 = arith.constant 0 : i32
    %c0_i32_2 = arith.constant 0 : i32
    return %c0_i32, %c0_i32_0, %c0_i32_1 : i32, i32, i32
  }
  func.func @transform_3(%arg0: i32) -> (i32, i32) {
    %c0_i32 = arith.constant 0 : i32
    %c0_i32_0 = arith.constant 0 : i32
    %c0_i32_1 = arith.constant 0 : i32
    return %c0_i32, %c0_i32_0 : i32, i32
  }
  func.func @transform_4(%arg0: i32) -> (i32, i32) {
    %c0_i32 = arith.constant 0 : i32
    %c0_i32_0 = arith.constant 0 : i32
    %c0_i32_1 = arith.constant 0 : i32
    return %c0_i32, %c0_i32_0 : i32, i32
  }
  func.func @transform_5(%arg0: i32) -> (i32, i32) {
    %c0_i32 = arith.constant 0 : i32
    %c0_i32_0 = arith.constant 0 : i32
    %c0_i32_1 = arith.constant 0 : i32
    return %c0_i32, %c0_i32_0 : i32, i32
  }
  func.func @transform_6(%arg0: i32) -> (i32, i32) {
    %c0_i32 = arith.constant 0 : i32
    %c0_i32_0 = arith.constant 0 : i32
    %c0_i32_1 = arith.constant 0 : i32
    return %c0_i32, %c0_i32_0 : i32, i32
  }
  func.func @transform_7(%arg0: i32) -> (i32, i32) {
    %c0_i32 = arith.constant 0 : i32
    %c0_i32_0 = arith.constant 0 : i32
    %c0_i32_1 = arith.constant 0 : i32
    return %c0_i32, %c0_i32_0 : i32, i32
  }
  func.func @transform_8(%arg0: i32) -> (i32, i32) {
    %c0_i32 = arith.constant 0 : i32
    %c0_i32_0 = arith.constant 0 : i32
    %c0_i32_1 = arith.constant 0 : i32
    return %c0_i32, %c0_i32_0 : i32, i32
  }
  func.func @transform_9(%arg0: i32) -> (i32, i32) {
    %c0_i32 = arith.constant 0 : i32
    %c0_i32_0 = arith.constant 0 : i32
    %c0_i32_1 = arith.constant 0 : i32
    return %c0_i32, %c0_i32_0 : i32, i32
  }
  func.func @transform_10(%arg0: i32) -> (i32, i32) {
    %c0_i32 = arith.constant 0 : i32
    %c0_i32_0 = arith.constant 0 : i32
    %c0_i32_1 = arith.constant 0 : i32
    return %c0_i32, %c0_i32_0 : i32, i32
  }
  func.func @transform_11(%arg0: i32) -> (i32, i32, i32) {
    %c0_i32 = arith.constant 0 : i32
    %c0_i32_0 = arith.constant 0 : i32
    %c0_i32_1 = arith.constant 0 : i32
    return %arg0, %c0_i32, %c0_i32_0 : i32, i32, i32
  }
}

</mosaic_0001>

<bundles_post_ra>
// kernel: tpu_custom_call.1
= control target key start
LH: loop header
LB: loop body
LE: loop exit
PB: predicated region body
PF: predicated region fallthrough
CT: control target
= control target key end

     0   :  { %s2423_s0 = inlined_call_operand.vmem [shape: f32[2,8,128], index: 0, kind: input, shape index: {}]   ;;  %s2424_s1 = inlined_call_operand.vmem [shape: f32[8,8,24], index: 1, kind: input, shape index: {}]   ;;  %s2425_s2 = inlined_call_operand.vmem [shape: f32[8,8,1], index: 2, kind: input, shape index: {}]   ;;  %s2426_s3 = inlined_call_operand.vmem [shape: f32[1,128], index: 3, kind: input, shape index: {}]   ;;  %s2427_s4 = inlined_call_operand.vmem [shape: f32[1,128], index: 4, kind: input, shape index: {}]   ;;  %s2428_s5 = inlined_call_operand.vmem [shape: f32[128,4], index: 5, kind: input, shape index: {}]   ;;  %s2429_s6 = inlined_call_operand.vmem [shape: f32[4,128], index: 6, kind: input, shape index: {}]   ;;  %s2430_s7 = inlined_call_operand.vmem [shape: f32[128,64], index: 7, kind: input, shape index: {}]   ;;  %s2431_s8 = inlined_call_operand.vmem [shape: f32[1,64], index: 8, kind: input, shape index: {}]   ;;  %s2432_s9 = inlined_call_operand.vmem [shape: f32[4,8], index: 9, kind: input, shape index: {}]   ;;  %s2433_s10 = inlined_call_operand.vmem [shape: f32[4,1], index: 10, kind: input, shape index: {}]   ;;  %s2434_s11 = inlined_call_operand.hbm [shape: f32[2,4,64], index: 11, kind: output, shape index: {}]  }
   0x1   :  { %2435 = sst [smem:[#allocation5_spill]] %s2423_s0 }
   0x2   :  { %16 = vsyncpa [#allocation3], 0 }
   0x3   :  { %18 = vsyncpa [#allocation3 + $0x1], 0  ;;  %s2024_s17 = smov 0   ;;  %s2026_s18 = smov 0  }
   0x4   :  { %s2028_s19 = smov 0   ;;  %s2030_s20 = smov 0  }
   0x5 LB: > { %s2045_s21 = sadd.s32 4294967295, %s1956_s20   ;;  %s1569_s22 = sadd.s32 4294967294, %s1956_s20   ;;  %s1956_s20 = sphi %s2030_s20, %s2446_s20   ;;  %s1952_s19 = sphi %s2028_s19, %s2445_s19   ;;  %s1948_s18 = sphi %s2026_s18, %s2444_s18   ;;  %s1944_s17 = sphi %s2024_s17, %s2443_s17  }
   0x6   : > { %s2049_s23 = sadd.s32 1, %s1956_s20   ;;  %s267_s24 = sadd.s32 1, %s1952_s19 }
   0x7   : > { %s264_s25 = ssub.s32 %s1956_s20, %s2049_s23  ;;  %p277_p0 = scmp.ne.s32.totalorder %s1952_s19, %s1948_s18 }
   0x8   : > { %p265_p1 = scmp.eq.s32.totalorder %s264_s25, 0  ;;  %p278_p2 = scmp.eq.s32.totalorder %s2045_s21, 1 }
   0x9   : > { %p283_p3 = scmp.ne.s32.totalorder %s1948_s18, %s1944_s17  ;;  %p284_p4 = scmp.eq.s32.totalorder %s1569_s22, 1 }
   0xa   : > { %s2060_s26 = scalar_select %p265_p1, %s1952_s19, %s267_s24  }
   0xb   : > { %p2062_p5 = por %p278_p2, %p277_p0  ;;  %p2066_p6 = por %p284_p4, %p283_p3 }
   0xc   : > { %p1572_p7 = scmp.ge.s32.totalorder %s1956_s20, 1  ;;  %p339_p8 = scmp.lt.s32.totalorder %s1956_s20, 3 }
   0xe   : > { %p340_p9 = pnand %p1572_p7, %p339_p8 }
   0xf   : > { %p378_p10 = scmp.lt.s32.totalorder (!%p340_p9), %s2045_s21, 1  ;;  %s2438_s0 = sld [smem:[#allocation5_spill]] (!%p340_p9) }
  0x10   : > { %343 = sbr.rel (%p340_p9) target bundleno = 3393 (0xd41), region = 64  ;;  %s1961_s22 = smov (!%p340_p9), 127  }
  0x11   : > { %s1962_s24 = smov (!%p340_p9), 1  }
  0x15   : > { %v1958_v0 = vmov 0.0   ;;  %vm1959_vm0 = vmmov 0   ;;  %v410_v1 = vld [vmem:[%s2425_s2] sm:$0xff]  ;;  %s379_s12 = scalar_select %p378_p10, %s2045_s21, 1  ;;  %v1960_v2 = vmov 0   ;;  %v383_v4 = vlaneseq  ;;  %v1579_v17 = vld [vmem:[%s2425_s2 + $0x8] sm:$0xff] }
  0x16   : > { %1696 = vmatprep.subr.mxu0 %v1958_v0  ;;  %1702 = vmatprep.mubr.msk.f32.mxu0 %vm1959_vm0, %v1958_v0  ;;  %v409_v10 = vld [vmem:[%s2424_s1] sm:$0xff]  ;;  %vm416_vm3 = vcmask 195584   ;;  %v1578_v19 = vld [vmem:[%s2424_s1 + $0x8] sm:$0xff]  ;;  %v1584_v26 = vld [vmem:[%s2425_s2 + $0x10] sm:$0xff]  ;;  %vm1218_vm4 = vcmask 1043456   ;;  %vm1211_vm5 = vcmask 31744  }
  0x17   : > { %1892 = vset.pattern.permute.xlu1 %v1960_v2  ;;  %1705 = vmatprep.subr.mxu1 %v1958_v0  ;;  %s1574_s13 = sshll.u32 %s379_s12, 3  ;;  %v384_v5 = vand.u32 127, %v383_v4  ;;  %v1589_v27 = vld [vmem:[%s2425_s2 + $0x18] sm:$0xff]  ;;  %v1583_v29 = vld [vmem:[%s2424_s1 + $0x10] sm:$0xff]  ;;  %v1594_v45 = vld [vmem:[%s2425_s2 + $0x20] sm:$0xff]  ;;  %vm1420_vm6 = vcmask 64512  }
  0x18   : > { %413 = vperm.xlu1 %1892, %v410_v1   ;;  %1711 = vmatprep.mubr.msk.f32.mxu1 %vm1959_vm0, %v1958_v0  ;;  %s381_s16 = scalar_lea.vmem %s2438_s0, %s1574_s13  ;;  %v1588_v37 = vld [vmem:[%s2424_s1 + $0x18] sm:$0xff]  ;;  %v1593_v47 = vld [vmem:[%s2424_s1 + $0x20] sm:$0xff]  ;;  %v1599_v54 = vld [vmem:[%s2425_s2 + $0x28] sm:$0xff]  ;;  %s1621_s13 = sshll.u32 %s2045_s21, 6  ;;  %vm1494_vm7 = vcmask 519168  }
  0x19   : > { %1893 = vset.pattern.permute.xlu0 %v1960_v2  ;;  %v2086_v3 = vld [vmem:[%s381_s16] sm:$0xff]  ;;  %v389_v6 = vand.u32 31, %v384_v5  ;;  %v1598_v56 = vld [vmem:[%s2424_s1 + $0x28] sm:$0xff]  ;;  %v1604_v63 = vld [vmem:[%s2425_s2 + $0x30] sm:$0xff]  ;;  %s2388_s29 = scalar_lea.hbm %s2434_s11, %s1621_s13  ;;  %s1963_s21 = smov [#allocation2]  }
  0x1a   : > { %404 = vrot.lane.b32.xlu0 %v2086_v3, %s1961_s22  ;;  %v1603_v2 = vld [vmem:[%s2424_s1 + $0x30] sm:$0xff]  ;;  %v1120_v7 = vld [vmem:[%s2428_s5 + $0x18] sm:$0xff]  ;;  %v1117_v9 = vld [vmem:[%s2428_s5] sm:$0xff] }
  0x1b   : > { %vm2092_vm1 = vcmp.ne.s32.totalorder %v389_v6, 31  ;;  %vm2099_vm2 = vcmp.ne.s32.totalorder %v389_v6, 0 }
  0x1e   : > { %399 = vrot.lane.b32.xlu0 %v2086_v3, %s1962_s24 }
  0x8c   : > { %v405_v8 = vpop.permute.xlu0 %404 }
  0x8d   : > { %1697 = vmatpush3.msk.msra.mxu0 %vm2092_vm1, %v405_v8 }
  0x8e   : > { %1698 = vmatprep.subr.mxu0 %v1958_v0 }
  0x8f   : > { %1699 = vmatpush3.msra.mxu0 %v2086_v3 }
  0x90   : > { %1700 = vmatprep.subr.mxu0 %v1958_v0  ;;  %v400_v11 = vpop.permute.xlu0 %399 }
  0x91   : > { %1701 = vmatpush3.msk.msra.mxu0 %vm2099_vm2, %v400_v11 }
  0x92   : > { %1703 = vmatmul.mubr.msk.f32.vlgmr.msra.gmra.mxu0 %vm416_vm3, %v409_v10  ;;  %1714 = vmatprep.subr.mxu0 %v1958_v0 }
  0x93   : > { %1720 = vmatprep.mubr.msk.f32.mxu0 %vm1959_vm0, %v1958_v0  ;;  %v414_v12 = vpop.permute.xlu1 %413 }
 0x152   : > { %v486_v13 = vpop.f32.mrf.mxu0 }
 0x153   : > { %v487_v14 = vadd.f32 %v486_v13, %v414_v12  ;;  %v1132_v12 = vld [vmem:[%s2428_s5 + $0x78] sm:$0xff]  ;;  %v1131_v13 = vld [vmem:[%s2428_s5 + $0x70] sm:$0xff] }
 0x154   : > { %v1704_v15 = vpop.f32.mrf.mxu0 }
 0x155   : > { %v490_v16 = vmax.f32 %v487_v14, 0.0  ;;  %v1414_v14 = vld [vmem:[%s2433_s10] sm:$0xf]  ;;  %v1609_v15 = vld [vmem:[%s2425_s2 + $0x38] sm:$0xff] }
 0x157   : > { %491 = vrot.lane.b32.xlu0 %v490_v16, %s1962_s24  ;;  %494 = vrot.lane.b32.xlu1 %v490_v16, %s1961_s22 }
 0x15b   : > { %503 = vperm.xlu1 %1892, %v1579_v17   ;;  %v1129_v17 = vld [vmem:[%s2428_s5 + $0x60] sm:$0xff] }
 0x1c9   : > { %v495_v18 = vpop.permute.xlu1 %494  ;;  %v492_v20 = vpop.permute.xlu0 %491 }
 0x1ca   : > { %1706 = vmatpush3.msk.msra.mxu1 %vm2092_vm1, %v495_v18  ;;  %v1128_v18 = vld [vmem:[%s2428_s5 + $0x58] sm:$0xff] }
 0x1cb   : > { %1707 = vmatprep.subr.mxu1 %v1958_v0 }
 0x1cc   : > { %1708 = vmatpush3.msra.mxu1 %v490_v16  ;;  %v1130_v16 = vld [vmem:[%s2428_s5 + $0x68] sm:$0xff] }
 0x1cd   : > { %1709 = vmatprep.subr.mxu1 %v1958_v0 }
 0x1ce   : > { %1710 = vmatpush3.msk.msra.mxu1 %vm2099_vm2, %v492_v20  ;;  %v1126_v20 = vld [vmem:[%s2428_s5 + $0x48] sm:$0xff] }
 0x1cf   : > { %1712 = vmatmul.mubr.msk.f32.vlgmr.msra.gmra.mxu1 %vm416_vm3, %v1578_v19  ;;  %1723 = vmatprep.subr.mxu1 %v1958_v0  ;;  %v1127_v19 = vld [vmem:[%s2428_s5 + $0x50] sm:$0xff] }
 0x1d0   : > { %1729 = vmatprep.mubr.msk.f32.mxu1 %vm1959_vm0, %v1958_v0 }
 0x1d6   : > { %v504_v21 = vpop.permute.xlu1 %503 }
 0x28f   : > { %v575_v22 = vpop.f32.mrf.mxu1 }
 0x290   : > { %v576_v23 = vadd.f32 %v575_v22, %v504_v21  ;;  %v1125_v21 = vld [vmem:[%s2428_s5 + $0x40] sm:$0xff]  ;;  %v1124_v22 = vld [vmem:[%s2428_s5 + $0x38] sm:$0xff] }
 0x291   : > { %v1713_v24 = vpop.f32.mrf.mxu1 }
 0x292   : > { %v579_v25 = vadd.f32 %v576_v23, %v2086_v3  ;;  %v1123_v23 = vld [vmem:[%s2428_s5 + $0x30] sm:$0xff]  ;;  %v1122_v24 = vld [vmem:[%s2428_s5 + $0x28] sm:$0xff] }
 0x294   : > { %580 = vrot.lane.b32.xlu1 %v579_v25, %s1962_s24  ;;  %583 = vrot.lane.b32.xlu0 %v579_v25, %s1961_s22 }
 0x298   : > { %592 = vperm.xlu0 %1893, %v1584_v26  }
 0x29c   : > { %681 = vperm.xlu0 %1893, %v1589_v27   ;;  %v1608_v27 = vld [vmem:[%s2424_s1 + $0x38] sm:$0xff] }
 0x306   : > { %v584_v28 = vpop.permute.xlu0 %583  ;;  %v581_v30 = vpop.permute.xlu1 %580 }
 0x307   : > { %1715 = vmatpush3.msk.msra.mxu0 %vm2092_vm1, %v584_v28 }
 0x308   : > { %1716 = vmatprep.subr.mxu0 %v1958_v0 }
 0x309   : > { %1717 = vmatpush3.msra.mxu0 %v579_v25 }
 0x30a   : > { %1718 = vmatprep.subr.mxu0 %v1958_v0 }
 0x30b   : > { %1719 = vmatpush3.msk.msra.mxu0 %vm2099_vm2, %v581_v30  ;;  %v1118_v30 = vld [vmem:[%s2428_s5 + $0x8] sm:$0xff] }
 0x30c   : > { %1721 = vmatmul.mubr.msk.f32.vlgmr.msra.gmra.mxu0 %vm416_vm3, %v1583_v29  ;;  %1732 = vmatprep.subr.mxu0 %v1958_v0  ;;  %v1119_v29 = vld [vmem:[%s2428_s5 + $0x10] sm:$0xff] }
 0x30d   : > { %1738 = vmatprep.mubr.msk.f32.mxu0 %vm1959_vm0, %v1958_v0 }
 0x313   : > { %v593_v31 = vpop.permute.xlu0 %592 }
 0x317   : > { %v682_v39 = vpop.permute.xlu0 %681 }
 0x3cc   : > { %v664_v32 = vpop.f32.mrf.mxu0 }
 0x3cd   : > { %v665_v33 = vadd.f32 %v664_v32, %v593_v31 }
 0x3ce   : > { %v1722_v34 = vpop.f32.mrf.mxu0 }
 0x3cf   : > { %v668_v35 = vmax.f32 %v665_v33, 0.0 }
 0x3d1   : > { %672 = vrot.lane.b32.xlu1 %v668_v35, %s1961_s22 }
 0x3d5   : > { %669 = vrot.lane.b32.xlu1 %v668_v35, %s1962_s24 }
 0x443   : > { %v673_v36 = vpop.permute.xlu1 %672 }
 0x444   : > { %1724 = vmatpush3.msk.msra.mxu1 %vm2092_vm1, %v673_v36 }
 0x445   : > { %1725 = vmatprep.subr.mxu1 %v1958_v0 }
 0x446   : > { %1726 = vmatpush3.msra.mxu1 %v668_v35 }
 0x447   : > { %1727 = vmatprep.subr.mxu1 %v1958_v0  ;;  %v670_v38 = vpop.permute.xlu1 %669 }
 0x448   : > { %1728 = vmatpush3.msk.msra.mxu1 %vm2099_vm2, %v670_v38  ;;  %v1210_v38 = vld [vmem:[%s2429_s6] sm:$0xf] }
 0x449   : > { %1730 = vmatmul.mubr.msk.f32.vlgmr.msra.gmra.mxu1 %vm416_vm3, %v1588_v37  ;;  %1741 = vmatprep.subr.mxu1 %v1958_v0 }
 0x44a   : > { %1747 = vmatprep.mubr.msk.f32.mxu1 %vm1959_vm0, %v1958_v0 }
 0x509   : > { %v753_v40 = vpop.f32.mrf.mxu1 }
 0x50a   : > { %v754_v41 = vadd.f32 %v753_v40, %v682_v39 }
 0x50b   : > { %v1731_v42 = vpop.f32.mrf.mxu1 }
 0x50c   : > { %v757_v43 = vadd.f32 %v754_v41, %v579_v25  ;;  %v1121_v25 = vld [vmem:[%s2428_s5 + $0x20] sm:$0xff]  ;;  %v1335_v42 = vld [vmem:[%s2430_s7 + $0x78] sm:$0xff] }
 0x50e   : > { %v758_v44 = vmax.f32 %v757_v43, 0.0  ;;  %v1334_v43 = vld [vmem:[%s2430_s7 + $0x70] sm:$0xff] }
 0x510   : > { %759 = vrot.lane.b32.xlu0 %v758_v44, %s1962_s24  ;;  %762 = vrot.lane.b32.xlu1 %v758_v44, %s1961_s22 }
 0x514   : > { %771 = vperm.xlu1 %1892, %v1594_v45   ;;  %v1332_v45 = vld [vmem:[%s2430_s7 + $0x60] sm:$0xff] }
 0x582   : > { %v763_v46 = vpop.permute.xlu1 %762  ;;  %v760_v48 = vpop.permute.xlu0 %759 }
 0x583   : > { %1733 = vmatpush3.msk.msra.mxu0 %vm2092_vm1, %v763_v46  ;;  %v1331_v46 = vld [vmem:[%s2430_s7 + $0x58] sm:$0xff] }
 0x584   : > { %1734 = vmatprep.subr.mxu0 %v1958_v0 }
 0x585   : > { %1735 = vmatpush3.msra.mxu0 %v758_v44 }
 0x586   : > { %1736 = vmatprep.subr.mxu0 %v1958_v0 }
 0x587   : > { %1737 = vmatpush3.msk.msra.mxu0 %vm2099_vm2, %v760_v48  ;;  %v1329_v48 = vld [vmem:[%s2430_s7 + $0x48] sm:$0xff] }
 0x588   : > { %1739 = vmatmul.mubr.msk.f32.vlgmr.msra.gmra.mxu0 %vm416_vm3, %v1593_v47  ;;  %1750 = vmatprep.subr.mxu0 %v1958_v0  ;;  %v1330_v47 = vld [vmem:[%s2430_s7 + $0x50] sm:$0xff] }
 0x589   : > { %1756 = vmatprep.mubr.msk.f32.mxu0 %vm1959_vm0, %v1958_v0 }
 0x58f   : > { %v772_v49 = vpop.permute.xlu1 %771 }
 0x648   : > { %v843_v50 = vpop.f32.mrf.mxu0 }
 0x649   : > { %v844_v51 = vadd.f32 %v843_v50, %v772_v49  ;;  %v1328_v49 = vld [vmem:[%s2430_s7 + $0x40] sm:$0xff]  ;;  %v1327_v50 = vld [vmem:[%s2430_s7 + $0x38] sm:$0xff] }
 0x64a   : > { %v1740_v52 = vpop.f32.mrf.mxu0 }
 0x64b   : > { %v847_v53 = vmax.f32 %v844_v51, 0.0  ;;  %v1326_v51 = vld [vmem:[%s2430_s7 + $0x30] sm:$0xff]  ;;  %v1325_v52 = vld [vmem:[%s2430_s7 + $0x28] sm:$0xff] }
 0x64d   : > { %848 = vrot.lane.b32.xlu1 %v847_v53, %s1962_s24  ;;  %851 = vrot.lane.b32.xlu0 %v847_v53, %s1961_s22 }
 0x651   : > { %860 = vperm.xlu0 %1893, %v1599_v54   ;;  %v1323_v54 = vld [vmem:[%s2430_s7 + $0x18] sm:$0xff] }
 0x6bf   : > { %v852_v55 = vpop.permute.xlu0 %851  ;;  %v849_v57 = vpop.permute.xlu1 %848 }
 0x6c0   : > { %1742 = vmatpush3.msk.msra.mxu1 %vm2092_vm1, %v852_v55  ;;  %v1322_v55 = vld [vmem:[%s2430_s7 + $0x10] sm:$0xff] }
 0x6c1   : > { %1743 = vmatprep.subr.mxu1 %v1958_v0 }
 0x6c2   : > { %1744 = vmatpush3.msra.mxu1 %v847_v53  ;;  %v1324_v53 = vld [vmem:[%s2430_s7 + $0x20] sm:$0xff] }
 0x6c3   : > { %1745 = vmatprep.subr.mxu1 %v1958_v0 }
 0x6c4   : > { %1746 = vmatpush3.msk.msra.mxu1 %vm2099_vm2, %v849_v57  ;;  %v1320_v57 = vld [vmem:[%s2430_s7] sm:$0xff] }
 0x6c5   : > { %1748 = vmatmul.mubr.msk.f32.vlgmr.msra.gmra.mxu1 %vm416_vm3, %v1598_v56  ;;  %1759 = vmatprep.subr.mxu1 %v1958_v0  ;;  %v1321_v56 = vld [vmem:[%s2430_s7 + $0x8] sm:$0xff] }
 0x6c6   : > { %1765 = vmatprep.mubr.msk.f32.mxu1 %vm1959_vm0, %v1958_v0 }
 0x6cc   : > { %v861_v58 = vpop.permute.xlu0 %860 }
 0x785   : > { %v932_v59 = vpop.f32.mrf.mxu1 }
 0x786   : > { %v933_v60 = vadd.f32 %v932_v59, %v861_v58 }
 0x787   : > { %v1749_v61 = vpop.f32.mrf.mxu1 }
 0x788   : > { %v2205_v62 = vadd.f32 %v933_v60, %v758_v44  ;;  %v1333_v44 = vld [vmem:[%s2430_s7 + $0x68] sm:$0xff] }
 0x78a   : > { %937 = vrot.lane.b32.xlu0 %v2205_v62, %s1962_s24  ;;  %940 = vrot.lane.b32.xlu1 %v2205_v62, %s1961_s22 }
 0x78e   : > { %949 = vperm.xlu1 %1892, %v1604_v63  }
 0x7fc   : > { %v941_v1 = vpop.permute.xlu1 %940  ;;  %v938_v4 = vpop.permute.xlu0 %937 }
 0x7fd   : > { %1751 = vmatpush3.msk.msra.mxu0 %vm2092_vm1, %v941_v1 }
 0x7fe   : > { %1752 = vmatprep.subr.mxu0 %v1958_v0 }
 0x7ff   : > { %1753 = vmatpush3.msra.mxu0 %v2205_v62 }
 0x800   : > { %1754 = vmatprep.subr.mxu0 %v1958_v0 }
 0x801   : > { %1755 = vmatpush3.msk.msra.mxu0 %vm2099_vm2, %v938_v4  ;;  %v1616_v4 = vld [vmem:[%s2426_s3] ss:$0 sm:$0xff] }
 0x802   : > { %1757 = vmatmul.mubr.msk.f32.vlgmr.msra.gmra.mxu0 %vm416_vm3, %v1603_v2  ;;  %1768 = vmatprep.subr.mxu0 %v1132_v12 }
 0x803   : > { %1769 = vmatpush3.msra.mxu0 %v1132_v12 }
 0x804   : > { %1770 = vmatprep.subr.mxu0 %v1131_v13 }
 0x805   : > { %1771 = vmatpush3.msra.mxu0 %v1131_v13  ;;  %v1413_v13 = vld [vmem:[%s2432_s9] sm:$0xf] }
 0x806   : > { %1772 = vmatprep.subr.mxu0 %v1130_v16 }
 0x807   : > { %1773 = vmatpush3.msra.mxu0 %v1130_v16 }
 0x808   : > { %1774 = vmatprep.subr.mxu0 %v1129_v17 }
 0x809   : > { %v950_v5 = vpop.permute.xlu1 %949  ;;  %1775 = vmatpush3.msra.mxu0 %v1129_v17 }
 0x80a   : > { %1776 = vmatprep.subr.mxu0 %v1128_v18 }
 0x80b   : > { %1777 = vmatpush3.msra.mxu0 %v1128_v18 }
 0x80c   : > { %1778 = vmatprep.subr.mxu0 %v1127_v19 }
 0x80d   : > { %1779 = vmatpush3.msra.mxu0 %v1127_v19 }
 0x80e   : > { %1780 = vmatprep.subr.mxu0 %v1126_v20 }
 0x80f   : > { %1781 = vmatpush3.msra.mxu0 %v1126_v20 }
 0x810   : > { %1782 = vmatprep.subr.mxu0 %v1125_v21 }
 0x811   : > { %1783 = vmatpush3.msra.mxu0 %v1125_v21 }
 0x812   : > { %1784 = vmatprep.subr.mxu0 %v1124_v22 }
 0x813   : > { %1785 = vmatpush3.msra.mxu0 %v1124_v22 }
 0x814   : > { %1786 = vmatprep.subr.mxu0 %v1123_v23 }
 0x815   : > { %1787 = vmatpush3.msra.mxu0 %v1123_v23 }
 0x816   : > { %1788 = vmatprep.subr.mxu0 %v1122_v24 }
 0x817   : > { %1789 = vmatpush3.msra.mxu0 %v1122_v24 }
 0x818   : > { %1790 = vmatprep.subr.mxu0 %v1121_v25 }
 0x819   : > { %1791 = vmatpush3.msra.mxu0 %v1121_v25 }
 0x81a   : > { %1792 = vmatprep.subr.mxu0 %v1120_v7 }
 0x81b   : > { %1793 = vmatpush3.msra.mxu0 %v1120_v7 }
 0x81c   : > { %1794 = vmatprep.subr.mxu0 %v1119_v29 }
 0x81d   : > { %1795 = vmatpush3.msra.mxu0 %v1119_v29 }
 0x81e   : > { %1796 = vmatprep.subr.mxu0 %v1118_v30 }
 0x81f   : > { %1797 = vmatpush3.msra.mxu0 %v1118_v30 }
 0x820   : > { %1798 = vmatprep.subr.mxu0 %v1117_v9 }
 0x821   : > { %1799 = vmatpush3.msra.mxu0 %v1117_v9 }
 0x822   : > { %1843 = vmatprep.subr.mxu0 %v1958_v0 }
 0x8c2   : > { %v1021_v6 = vpop.f32.mrf.mxu0 }
 0x8c3   : > { %v1022_v8 = vadd.f32 %v1021_v6, %v950_v5 }
 0x8c4   : > { %v1758_v10 = vpop.f32.mrf.mxu0 }
 0x8c5   : > { %v1025_v11 = vmax.f32 %v1022_v8, 0.0  ;;  %v1618_v10 = vld [vmem:[%s2431_s8] ss:$0 sm:$0xff] }
 0x8c7   : > { %1026 = vrot.lane.b32.xlu1 %v1025_v11, %s1962_s24  ;;  %1029 = vrot.lane.b32.xlu0 %v1025_v11, %s1961_s22  ;;  %s375_s22 = sand.u32 1, %s1948_s18  }
 0x8c8   : > { %s1573_s24 = sshll.u32 %s375_s22, 2  ;;  %s1497_s30 = scalar_lea.sflag [#allocation3], %s375_s22 }
 0x8c9   : > { %s377_s14 = scalar_lea.vmem [#allocation2], %s1573_s24  ;;  %s1900_s24 = sshll.u32 %s1963_s21, 4  ;;  %s1901_s24 = int_to_ptr.vmem [resolvable:$false] %s1900_s24 }
 0x8ca   : > { %s1510_s15 = sshll.u32 %s377_s14, 4  ;;  %s1902_s0 = scalar_lea.vmem %s1901_s24, 128  ;;  %s1511_s15 = int_to_ptr.vmem [resolvable:$true] %s1510_s15 }
 0x8cb   : > { %1417 = vperm.xlu1 %1892, %v1414_v14   ;;  %1038 = vperm.xlu0 %1893, %v1609_v15   ;;  %s1896_s12 = scalar_lea.vmem %s1511_s15, 64  ;;  %p1903_p0 = scmp.lt.s32.totalorder %s1511_s15, %s1901_s24 }
 0x8cc   : > { %p1897_p11 = scmp.ne.s32.totalorder %s1511_s15, %s1896_s12  ;;  %p1904_p1 = scmp.lt.s32.totalorder %s1902_s0, %s1896_s12 }
 0x8ce   : > { %p1898_p12 = pnand %p1897_p11, %p2062_p5  ;;  %p1905_p2 = por %p1904_p1, %p1903_p0 }
 0x8d0   : > { %p1899_p13 = pneg %p1898_p12 }
 0x8d2   : > { %p1906_p3 = pnand %p1905_p2, %p1899_p13 }
 0x939   : > { %v1030_v26 = vpop.permute.xlu0 %1029  ;;  %v1027_v28 = vpop.permute.xlu1 %1026 }
 0x93a   : > { %1760 = vmatpush3.msk.msra.mxu1 %vm2092_vm1, %v1030_v26 }
 0x93b   : > { %1761 = vmatprep.subr.mxu1 %v1958_v0 }
 0x93c   : > { %1762 = vmatpush3.msra.mxu1 %v1025_v11 }
 0x93d   : > { %1763 = vmatprep.subr.mxu1 %v1958_v0 }
 0x93e   : > { %1764 = vmatpush3.msk.msra.mxu1 %vm2099_vm2, %v1027_v28 }
 0x93f   : > { %1766 = vmatmul.mubr.msk.f32.vlgmr.msra.gmra.mxu1 %vm416_vm3, %v1608_v27  ;;  %1803 = vmatprep.subr.msk.mxu1 %vm1218_vm4, %v1210_v38 }
 0x940   : > { %1804 = vmatpush3.msk.msra.mxu1 %vm1218_vm4, %v1210_v38 }
 0x941   : > { %1808 = vmatprep.subr.mxu1 %v1958_v0 }
 0x946   : > { %v1039_v31 = vpop.permute.xlu0 %1038  ;;  %v1418_v15 = vpop.permute.xlu1 %1417 }
 0x9ff   : > { %v1110_v32 = vpop.f32.mrf.mxu1 }
 0xa00   : > { %v1111_v33 = vadd.f32 %v1110_v32, %v1039_v31 }
 0xa01   : > { %v1767_v34 = vpop.f32.mrf.mxu1 }
 0xa02   : > { %v1114_v35 = vadd.f32 %v1111_v33, %v2205_v62 }
 0xa04   : > { %v2294_v36 = vadd.f32 %v1114_v35, %v2086_v3 }
 0xa06   : > { %1800 = vmatprep.mubr.f32.mxu0 %v2294_v36  ;;  %v1116_v37 = vmul.f32 %v2294_v36, %v2294_v36 }
 0xa08   : > { %1801 = vmatmul.mubr.f32.vlgmr.msra.gmra.mxu0 %v1116_v37 }
 0xa09   : > { %1845 = vmatprep.mubr.msk.f32.mxu0 %vm1959_vm0, %v1958_v0 }
 0xac8   : > { %v1802_v3 = vpop.f32.mrf.mxu0 }
 0xac9   : > { %v1209_v41 = vmul.f32 0.03125, %v1802_v3 }
 0xaca   : > { %v1199_v39 = vpop.f32.mrf.mxu0 }
 0xacb   : > { %v1208_v40 = vmul.f32 0.03125, %v1199_v39 }
 0xacd   : > { %1805 = vmatprep.mubr.msk.f32.mxu1 %vm1211_vm5, %v1208_v40 }
 0xace   : > { %1806 = vmatmul.mubr.msk.f32.vlgmr.msra.gmra.mxu1 %vm1211_vm5, %v1209_v41 }
 0xacf   : > { %1840 = vmatprep.mubr.msk.f32.mxu1 %vm1959_vm0, %v1958_v0  ;;  %1809 = vmatpush3.msra.mxu1 %v1335_v42 }
 0xad0   : > { %1810 = vmatprep.subr.mxu1 %v1958_v0 }
 0xad1   : > { %1811 = vmatpush3.msra.mxu1 %v1334_v43 }
 0xad2   : > { %1812 = vmatprep.subr.mxu1 %v1958_v0 }
 0xad3   : > { %1813 = vmatpush3.msra.mxu1 %v1333_v44 }
 0xad4   : > { %1814 = vmatprep.subr.mxu1 %v1958_v0 }
 0xad5   : > { %1815 = vmatpush3.msra.mxu1 %v1332_v45 }
 0xad6   : > { %1816 = vmatprep.subr.mxu1 %v1958_v0 }
 0xad7   : > { %1817 = vmatpush3.msra.mxu1 %v1331_v46 }
 0xad8   : > { %1818 = vmatprep.subr.mxu1 %v1958_v0 }
 0xad9   : > { %1819 = vmatpush3.msra.mxu1 %v1330_v47 }
 0xada   : > { %1820 = vmatprep.subr.mxu1 %v1958_v0 }
 0xadb   : > { %1821 = vmatpush3.msra.mxu1 %v1329_v48 }
 0xadc   : > { %1822 = vmatprep.subr.mxu1 %v1958_v0 }
 0xadd   : > { %1823 = vmatpush3.msra.mxu1 %v1328_v49 }
 0xade   : > { %1824 = vmatprep.subr.mxu1 %v1958_v0 }
 0xadf   : > { %1825 = vmatpush3.msra.mxu1 %v1327_v50 }
 0xae0   : > { %1826 = vmatprep.subr.mxu1 %v1958_v0 }
 0xae1   : > { %1827 = vmatpush3.msra.mxu1 %v1326_v51 }
 0xae2   : > { %1828 = vmatprep.subr.mxu1 %v1958_v0 }
 0xae3   : > { %1829 = vmatpush3.msra.mxu1 %v1325_v52 }
 0xae4   : > { %1830 = vmatprep.subr.mxu1 %v1958_v0 }
 0xae5   : > { %1831 = vmatpush3.msra.mxu1 %v1324_v53 }
 0xae6   : > { %1832 = vmatprep.subr.mxu1 %v1958_v0 }
 0xae7   : > { %1833 = vmatpush3.msra.mxu1 %v1323_v54 }
 0xae8   : > { %1834 = vmatprep.subr.mxu1 %v1958_v0 }
 0xae9   : > { %1835 = vmatpush3.msra.mxu1 %v1322_v55 }
 0xaea   : > { %1836 = vmatprep.subr.mxu1 %v1958_v0 }
 0xaeb   : > { %1837 = vmatpush3.msra.mxu1 %v1321_v56 }
 0xaec   : > { %1838 = vmatprep.subr.mxu1 %v1958_v0  ;;  %v1617_v0 = vld [vmem:[%s2427_s4] ss:$0 sm:$0xff] }
 0xaed   : > { %1839 = vmatpush3.msra.mxu1 %v1320_v57 }
 0xb8e   : > { %v1807_v58 = vpop.f32.mrf.mxu1 }
 0xb90   : > { %v1288_v59 = vpop.f32.mrf.mxu1 }
 0xb91   : > { %v1297_v60 = vmul.f32 %v1288_v59, %v1288_v59  ;;  %v1300_v1 = vsub.f32 %v2294_v36, %v1288_v59 }
 0xb93   : > { %v1298_v61 = vsub.f32 %v1807_v58, %v1297_v60 }
 0xb95   : > { %v1299_v62 = vmax.f32 %v1298_v61, 0.0 }
 0xb97   : > { %v1301_v63 = vadd.f32 1e-05, %v1299_v62 }
 0xb99   : > { %1894 = vrsqrt.f32 %v1301_v63 }
 0xba6   : > { %v1895_v2 = vpop.eup %1894 }
 0xba7   : > { %v1303_v5 = vmul.f32 %v1895_v2, %v1300_v1 }
 0xba9   : > { %v1311_v6 = vmul.f32 %v1616_v4, %v1303_v5 }
 0xbab   : > { %v1319_v8 = vadd.f32 %v1617_v0, %v1311_v6 }
 0xbad   : > { %1841 = vmatmul.mubr.f32.vlgmr.msra.gmra.mxu1 %v1319_v8 }
 0xc6d   : > { %v1409_v11 = vpop.f32.mrf.mxu1 }
 0xc6e   : > { %v1410_v12 = vadd.f32 %v1618_v10, %v1409_v11 }
 0xc6f   : > { %v1842_v14 = vpop.f32.mrf.mxu1 }
 0xc70   : > { %1844 = vmatpush3.msra.mxu0 %v1410_v12 }
 0xc71   : > { %1846 = vmatmul.mubr.msk.f32.vlgmr.msra.gmra.mxu0 %vm1420_vm6, %v1413_v13 }
 0xd31   : > { %v1490_v16 = vpop.f32.mrf.mxu0 }
 0xd32   : > { %v1491_v17 = vadd.f32 %v1490_v16, %v1418_v15 }
 0xd33   : > { %v1847_v18 = vpop.f32.mrf.mxu0 }
 0xd34   : > { %1495 = vst.msk [vmem:[%s377_s14] sm:$0xf] %vm1494_vm7, %v1491_v17 }
 0xd35   : > { %1909 = shalt.err (!%p1906_p3)
}
 0xd36   : > { %s1910_s13 = scalar_lea.hbm %s2388_s29, 64  ;;  %s1914_s16 = scalar_lea.hbm %s2434_s11, 128 }
 0xd37   : > { %p1911_p4 = scmp.ne.s32.totalorder %s2388_s29, %s1910_s13  ;;  %p1915_p9 = scmp.lt.s32.totalorder %s2388_s29, %s2434_s11 }
 0xd38   : > { %p1916_p10 = scmp.lt.s32.totalorder %s1914_s16, %s1910_s13 }
 0xd39   : > { %p1912_p7 = pnand %p1911_p4, %p2062_p5 }
 0xd3a   : > { %p1917_p11 = por %p1916_p10, %p1915_p9 }
 0xd3b   : > { %p1913_p8 = pneg %p1912_p7 }
 0xd3d   : > { %p1918_p12 = pnand %p1917_p11, %p1913_p8 }
 0xd3f   : > { %1921 = shalt.err (!%p1918_p12)
}
 0xd40   : > { %1848 = dma.vmem_to_hbm [thread:$0]  (%p2062_p5), %s1511_s15, 64, %s2388_s29, %s1497_s30  }
 0xd41 PF: > { %p1854_p13 = scmp.ge.s32.totalorder %s1956_s20, 2  ;;  %s1522_s0 = sand.u32 1, %s1944_s17  }
 0xd42   : > { %s1523_s12 = scalar_lea.sflag [#allocation3], %s1522_s0 }
 0xd43   : > { %p1851_p0 = pnand %p1854_p13, %p2066_p6 }
 0xd45   : > { %p1852_p1 = pneg %p1851_p0 }
 0xd47   : > { %1939 = dma.done.wait (%p1852_p1), %s1523_s12, 64  }
 0xd48   : > { %1941 = vsyncadd (%p1852_p1), %s1523_s12, 4294967232  ;;  %p21_p2 = scmp.ge.s32.totalorder %s2049_s23, 4   ;;  %s2443_s17 = smov %s1948_s18 }
 0xd49   : > { %s2444_s18 = smov %s1952_s19  ;;  %s2445_s19 = smov %s2060_s26 }
 0xd4a   : > { %s2446_s20 = smov %s2049_s23  ;;  %23 = sbr.rel (!%p21_p2) target bundleno = 5 (0x5), region = 113 }
 0xd4f   :  { %1528 = vsyncpa [#allocation3], 1 }
 0xd50   :  { %1530 = vsyncpa [#allocation3 + $0x1], 1 }

</bundles_post_ra>
